<compile_context>
chip_gen: v7x
topology: tpu7x:2x2x1
jax: 0.10.0
libtpu: 0.0.40
codegen_flags: <defaults>
</compile_context>

<pallas_src>
import math

import jax
import jax.numpy as jnp
import numpy as np
from jax import lax
from jax.experimental import pallas as pl
from jax.experimental.pallas import tpu as pltpu


def _conv_up_kernel(x_ref, y_ref, t2b_ref,
                    s1_ref, t1_ref, m1_ref,
                    s2_ref, m2_ref, b2_ref,
                    o_ref, pad1, pad2):
    Bt, H, WCin = x_ref.shape
    WCout = o_ref.shape[-1]

    # Zero the 1-row top/bottom halos every step.  Never gate this on
    # program_id == 0: under "parallel" semantics each core owns a private
    # scratch and might not run iteration 0 (stale-VMEM hazard on v7x).
    pad1[:, pl.ds(0, 1), :] = jnp.zeros((Bt, 1, WCin), pad1.dtype)
    pad1[:, pl.ds(H + 1, 1), :] = jnp.zeros((Bt, 1, WCin), pad1.dtype)
    pad2[:, pl.ds(0, 1), :] = jnp.zeros((Bt, 1, WCout), pad2.dtype)
    pad2[:, pl.ds(H + 1, 1), :] = jnp.zeros((Bt, 1, WCout), pad2.dtype)

    # ---- stage 1: BN1 -> ReLU (f32 VPU), row-padded lane-dense scratch ----
    a1 = jnp.maximum(x_ref[...] * s1_ref[...] + t1_ref[...], 0.0)
    pad1[:, pl.ds(1, H), :] = a1

    # Conv1 as ONE MXU matmul: im2col over the 3 ky taps (kx taps + channel
    # contraction already folded into the banded weights), batch folded into M.
    lhs1 = jnp.concatenate(
        [pad1[:, pl.ds(ky, H), :] for ky in range(3)], axis=-1,
    ).reshape(Bt * H, 3 * WCin).astype(jnp.bfloat16)
    acc1 = jnp.dot(lhs1, m1_ref[...], preferred_element_type=jnp.float32)
    acc1 = acc1.reshape(Bt, H, WCout)

    # ---- skip + style + conv1 bias folded into the per-image BN2 shift ----
    # a2 = ReLU( sc2*(h1 + y + feat) + sh2 ) = ReLU( (acc1 + y)*sc2 + t2b )
    a2 = jnp.maximum((acc1 + y_ref[...]) * s2_ref[...] + t2b_ref[...], 0.0)
    pad2[:, pl.ds(1, H), :] = a2

    # ---- stage 2: banded Conv3x3 (Cout -> Cout) as ONE MXU matmul ----
    lhs2 = jnp.concatenate(
        [pad2[:, pl.ds(ky, H), :] for ky in range(3)], axis=-1,
    ).reshape(Bt * H, 3 * WCout).astype(jnp.bfloat16)
    acc2 = jnp.dot(lhs2, m2_ref[...], preferred_element_type=jnp.float32)

    o_ref[...] = (acc2 + b2_ref[...]).reshape(Bt, H, WCout).astype(o_ref.dtype)


def _fold_bn(gamma, beta, mean, var, eps=1e-5):
    scale = gamma / jnp.sqrt(var + eps)
    return scale, beta - mean * scale


def _banded_conv_weights(w, width):
    """HWIO (3,3,Ci,Co) -> (3*width*Ci, width*Co).

    Per-ky banded block-Toeplitz matrices (kx taps + channel contraction folded
    into one K dim; kx zero-padding handled by the band edges), stacked along K
    in ky order to match the in-kernel im2col concatenation:
        M[ky*W*Ci + (j+kx-1)*Ci + ci, j*Co + co] = w[ky, kx, ci, co]
    """
    _, _, ci, co = w.shape
    jp = jnp.arange(width)[:, None]
    j = jnp.arange(width)[None, :]
    d = jp - j + 1                                   # kx index, valid in [0,3)
    valid = (d >= 0) & (d < 3)
    dc = jnp.clip(d, 0, 2)
    bands = []
    for ky in range(3):
        wk = w[ky][dc]                               # (W, W, Ci, Co)
        wk = jnp.where(valid[:, :, None, None], wk, 0.0)
        bands.append(wk.transpose(0, 2, 1, 3).reshape(width * ci, width * co))
    return jnp.concatenate(bands, axis=0)            # (3*W*Ci, W*Co)


def _round_up_channels(c, width):
    """Smallest c_pad >= c such that width * c_pad is a multiple of 128."""
    m = 128 // math.gcd(width, 128)
    return ((c + m - 1) // m) * m


def convolution_up_block(x, y, style, params):
    """x: (B,H,W,Cin), y: (B,H,W,Cout), style: (B,Cs)  -> (B,H,W,Cout)."""
    B, H, W, Cin = x.shape
    Cout = params["w2"].shape[-1]

    # Channel padding (perf only): lane-dense W*Cin, zero-padded channels
    # contribute nothing (scale/shift/weights padded with zeros).
    Cin_p = _round_up_channels(Cin, W)
    pc = Cin_p - Cin
    WCin, WCout = W * Cin_p, W * Cout

    # Inference-mode BN folded to scale/shift, tiled across W so it broadcasts
    # against the lane-dense (.., H, W*C) layout.
    sc1, sh1 = _fold_bn(params["gamma1"], params["beta1"],
                        params["mean1"], params["var1"])
    sc2, sh2 = _fold_bn(params["gamma2"], params["beta2"],
                        params["mean2"], params["var2"])
    sc1 = jnp.pad(sc1, (0, pc))
    sh1 = jnp.pad(sh1, (0, pc))
    s1w = jnp.tile(sc1, W).reshape(1, WCin)
    t1w = jnp.tile(sh1, W).reshape(1, WCin)
    s2w = jnp.tile(sc2, W).reshape(1, WCout)
    b2w = jnp.tile(params["b2"], W).reshape(1, WCout)

    # Style Linear + conv1 bias folded through BN2 (per-image shift).
    feat = jnp.dot(style, params["lw"],
                   precision=lax.Precision.HIGHEST) + params["lb"]   # (B, Cout)
    t2b = sh2[None, :] + sc2[None, :] * (params["b1"][None, :] + feat)
    t2bw = jnp.tile(t2b, (1, W)).reshape(B, 1, WCout)

    # Banded conv weights, ky taps stacked along K, bf16 MXU operands.
    w1p = jnp.pad(params["w1"], ((0, 0), (0, 0), (0, pc), (0, 0)))
    m1 = _banded_conv_weights(w1p, W).astype(jnp.bfloat16)           # (3*WCin, WCout)
    m2 = _banded_conv_weights(params["w2"], W).astype(jnp.bfloat16)  # (3*WCout, WCout)

    # Lane-dense 3-D per-image layout.
    x2 = jnp.pad(x, ((0, 0), (0, 0), (0, 0), (0, pc))).reshape(B, H, WCin)
    y2 = y.reshape(B, H, WCout)

    # Batch blocking: keep >= 2 grid steps when B >= 2 so both v7x TensorCores
    # get work (and DMA/compute overlap exists); otherwise whole batch per step.
    cands = [d for d in range(1, B + 1) if B % d == 0 and B // d >= 2]
    bt = max(cands) if cands else B
    grid = (B // bt,)

    full = lambda *shape: pl.BlockSpec(shape, lambda g: (0,) * len(shape))

    grid_spec = pltpu.PrefetchScalarGridSpec(
        num_scalar_prefetch=0,
        grid=grid,
        in_specs=[
            pl.BlockSpec((bt, H, WCin), lambda g: (g, 0, 0)),     # x
            pl.BlockSpec((bt, H, WCout), lambda g: (g, 0, 0)),    # y (skip)
            pl.BlockSpec((bt, 1, WCout), lambda g: (g, 0, 0)),    # per-image BN2 shift
            full(1, WCin),                 # BN1 scale
            full(1, WCin),                 # BN1 shift
            full(3 * WCin, WCout),         # banded conv1 weights (bf16)
            full(1, WCout),                # BN2 scale
            full(3 * WCout, WCout),        # banded conv2 weights (bf16)
            full(1, WCout),                # conv2 bias
        ],
        out_specs=pl.BlockSpec((bt, H, WCout), lambda g: (g, 0, 0)),
        scratch_shapes=[
            pltpu.VMEM((bt, H + 2, WCin), jnp.float32),   # row-padded stage-1 act
            pltpu.VMEM((bt, H + 2, WCout), jnp.float32),  # row-padded stage-2 act
        ],
    )

    # Rough VMEM budget (double-buffered tiles + scratch + weights), clamped to
    # what every TPU generation can provide (v7x has 64 MiB physical VMEM).
    tile_b = 4 * bt * H * (WCin + 2 * WCout)
    scr_b = 4 * bt * (H + 2) * (WCin + WCout)
    wgt_b = 2 * 3 * (WCin + WCout) * WCout
    vmem_limit = int(min(max(4 * tile_b + scr_b + 2 * wgt_b, 32 << 20), 64 << 20))

    out2 = pl.pallas_call(
        _conv_up_kernel,
        out_shape=jax.ShapeDtypeStruct((B, H, WCout), jnp.float32),
        grid_spec=grid_spec,
        compiler_params=pltpu.CompilerParams(
            dimension_semantics=("parallel",),
            vmem_limit_bytes=vmem_limit),
    )(x2, y2, t2bw, s1w, t1w, m1, s2w, m2, b2w)

    return out2.reshape(B, H, W, Cout)


def reference_forward(x, y, style, params):
    """Pure-JAX reference (NHWC / HWIO), same folded-BN semantics."""
    s1, t1 = _fold_bn(params["gamma1"], params["beta1"],
                      params["mean1"], params["var1"])
    s2, t2 = _fold_bn(params["gamma2"], params["beta2"],
                      params["mean2"], params["var2"])
    dn = ("NHWC", "HWIO", "NHWC")

    a = jnp.maximum(x * s1 + t1, 0.0)
    h1 = lax.conv_general_dilated(a, params["w1"], (1, 1), "SAME",
                                  dimension_numbers=dn,
                                  precision=lax.Precision.HIGHEST)
    h1 = h1 + params["b1"]
    feat = jnp.dot(style, params["lw"],
                   precision=lax.Precision.HIGHEST) + params["lb"]
    z = h1 + y + feat[:, None, None, :]
    a2 = jnp.maximum(z * s2 + t2, 0.0)
    out = lax.conv_general_dilated(a2, params["w2"], (1, 1), "SAME",
                                   dimension_numbers=dn,
                                   precision=lax.Precision.HIGHEST)
    return out + params["b2"]


if __name__ == "__main__":
    B, H, W = 2, 16, 16
    Cin, Cout, Cs = 4, 8, 16

    key = jax.random.PRNGKey(0)
    ks = jax.random.split(key, 20)

    params = {
        # BN1 (over Cin)
        "gamma1": 1.0 + 0.1 * jax.random.normal(ks[0], (Cin,), jnp.float32),
        "beta1": 0.1 * jax.random.normal(ks[1], (Cin,), jnp.float32),
        "mean1": 0.1 * jax.random.normal(ks[2], (Cin,), jnp.float32),
        "var1": jax.random.uniform(ks[3], (Cin,), jnp.float32, 0.5, 1.5),
        # Conv1: HWIO (3,3,Cin,Cout)
        "w1": 0.1 * jax.random.normal(ks[4], (3, 3, Cin, Cout), jnp.float32),
        "b1": 0.1 * jax.random.normal(ks[5], (Cout,), jnp.float32),
        # Linear(style_channels -> Cout), stored pre-transposed (Cs, Cout)
        "lw": 0.1 * jax.random.normal(ks[6], (Cs, Cout), jnp.float32),
        "lb": 0.1 * jax.random.normal(ks[7], (Cout,), jnp.float32),
        # BN2 (over Cout)
        "gamma2": 1.0 + 0.1 * jax.random.normal(ks[8], (Cout,), jnp.float32),
        "beta2": 0.1 * jax.random.normal(ks[9], (Cout,), jnp.float32),
        "mean2": 0.1 * jax.random.normal(ks[10], (Cout,), jnp.float32),
        "var2": jax.random.uniform(ks[11], (Cout,), jnp.float32, 0.5, 1.5),
        # Conv2: HWIO (3,3,Cout,Cout)
        "w2": 0.1 * jax.random.normal(ks[12], (3, 3, Cout, Cout), jnp.float32),
        "b2": 0.1 * jax.random.normal(ks[13], (Cout,), jnp.float32),
    }

    # Inputs (NHWC; equivalent PyTorch NCHW shapes: x (2,4,16,16), y (2,8,16,16))
    x = jax.random.normal(ks[14], (B, H, W, Cin), jnp.float32)
    y = jax.random.normal(ks[15], (B, H, W, Cout), jnp.float32)
    style = jax.random.normal(ks[16], (B, Cs), jnp.float32)

    out = convolution_up_block(x, y, style, params)
    out = jax.block_until_ready(out)

    ref = jax.block_until_ready(reference_forward(x, y, style, params))
    np.testing.assert_allclose(np.asarray(out), np.asarray(ref),
                               rtol=2e-2, atol=2e-2)

    print("KERNEL_OK")
</pallas_src>

<mosaic_0001>
module attributes {stable_mosaic.version = 11 : i64} {
  func.func @_conv_up_kernel(%arg0: i32, %arg1: memref<1x16x128xf32, #tpu.memory_space<vmem>>, %arg2: memref<1x16x128xf32, #tpu.memory_space<vmem>>, %arg3: memref<1x1x128xf32, #tpu.memory_space<vmem>>, %arg4: memref<1x128xf32, #tpu.memory_space<vmem>>, %arg5: memref<1x128xf32, #tpu.memory_space<vmem>>, %arg6: memref<384x128xbf16, #tpu.memory_space<vmem>>, %arg7: memref<1x128xf32, #tpu.memory_space<vmem>>, %arg8: memref<384x128xbf16, #tpu.memory_space<vmem>>, %arg9: memref<1x128xf32, #tpu.memory_space<vmem>>, %arg10: memref<1x16x128xf32, #tpu.memory_space<vmem>>, %arg11: memref<1x18x128xf32, #tpu.memory_space<vmem>>, %arg12: memref<1x18x128xf32, #tpu.memory_space<vmem>>) attributes {dimension_semantics = [#tpu.dimension_semantics<parallel>], iteration_bounds = array<i64: 2>, scalar_prefetch = 0 : i64, scratch_operands = 2 : i64, tpu.core_type = #tpu.core_type<tc>, window_params = [{transform_indices = @transform_0, window_bounds = array<i64: 1, 16, 128>}, {transform_indices = @transform_1, window_bounds = array<i64: 1, 16, 128>}, {transform_indices = @transform_2, window_bounds = array<i64: 1, 1, 128>}, {pipeline_mode = #tpu.pipeline_mode<synchronous>, transform_indices = @transform_3, window_bounds = array<i64: 1, 128>}, {pipeline_mode = #tpu.pipeline_mode<synchronous>, transform_indices = @transform_4, window_bounds = array<i64: 1, 128>}, {pipeline_mode = #tpu.pipeline_mode<synchronous>, transform_indices = @transform_5, window_bounds = array<i64: 384, 128>}, {pipeline_mode = #tpu.pipeline_mode<synchronous>, transform_indices = @transform_6, window_bounds = array<i64: 1, 128>}, {pipeline_mode = #tpu.pipeline_mode<synchronous>, transform_indices = @transform_7, window_bounds = array<i64: 384, 128>}, {pipeline_mode = #tpu.pipeline_mode<synchronous>, transform_indices = @transform_8, window_bounds = array<i64: 1, 128>}, {transform_indices = @transform_9, window_bounds = array<i64: 1, 16, 128>}]} {
    %cst = arith.constant 0.000000e+00 : f32
    %0 = vector.broadcast %cst : f32 to vector<1x1x128xf32>
    %c0 = arith.constant 0 : index
    %c0_0 = arith.constant 0 : index
    %c0_1 = arith.constant 0 : index
    %1 = vector.load %arg11[%c0, %c0_0, %c0_1] : memref<1x18x128xf32, #tpu.memory_space<vmem>>, vector<1x1x128xf32>
    tpu.vector_store %arg11[%c0, %c0_0, %c0_1], %0 {strides = array<i32>} : memref<1x18x128xf32, #tpu.memory_space<vmem>>, vector<1x1x128xf32>,
    %cst_2 = arith.constant 0.000000e+00 : f32
    %2 = vector.broadcast %cst_2 : f32 to vector<1x1x128xf32>
    %c0_3 = arith.constant 0 : index
    %c17 = arith.constant 17 : index
    %c0_4 = arith.constant 0 : index
    %3 = vector.load %arg11[%c0_3, %c17, %c0_4] : memref<1x18x128xf32, #tpu.memory_space<vmem>>, vector<1x1x128xf32>
    tpu.vector_store %arg11[%c0_3, %c17, %c0_4], %2 {strides = array<i32>} : memref<1x18x128xf32, #tpu.memory_space<vmem>>, vector<1x1x128xf32>,
    %cst_5 = arith.constant 0.000000e+00 : f32
    %4 = vector.broadcast %cst_5 : f32 to vector<1x1x128xf32>
    %c0_6 = arith.constant 0 : index
    %c0_7 = arith.constant 0 : index
    %c0_8 = arith.constant 0 : index
    %5 = vector.load %arg12[%c0_6, %c0_7, %c0_8] : memref<1x18x128xf32, #tpu.memory_space<vmem>>, vector<1x1x128xf32>
    tpu.vector_store %arg12[%c0_6, %c0_7, %c0_8], %4 {strides = array<i32>} : memref<1x18x128xf32, #tpu.memory_space<vmem>>, vector<1x1x128xf32>,
    %cst_9 = arith.constant 0.000000e+00 : f32
    %6 = vector.broadcast %cst_9 : f32 to vector<1x1x128xf32>
    %c0_10 = arith.constant 0 : index
    %c17_11 = arith.constant 17 : index
    %c0_12 = arith.constant 0 : index
    %7 = vector.load %arg12[%c0_10, %c17_11, %c0_12] : memref<1x18x128xf32, #tpu.memory_space<vmem>>, vector<1x1x128xf32>
    tpu.vector_store %arg12[%c0_10, %c17_11, %c0_12], %6 {strides = array<i32>} : memref<1x18x128xf32, #tpu.memory_space<vmem>>, vector<1x1x128xf32>,
    %c0_13 = arith.constant 0 : index
    %c0_14 = arith.constant 0 : index
    %c0_15 = arith.constant 0 : index
    %8 = vector.load %arg1[%c0_13, %c0_14, %c0_15] : memref<1x16x128xf32, #tpu.memory_space<vmem>>, vector<1x16x128xf32>
    %c0_16 = arith.constant 0 : index
    %c0_17 = arith.constant 0 : index
    %9 = vector.load %arg4[%c0_16, %c0_17] : memref<1x128xf32, #tpu.memory_space<vmem>>, vector<1x128xf32>
    %10 = vector.shape_cast %9 : vector<1x128xf32> to vector<1x1x128xf32>
    %11 = vector.broadcast %10 : vector<1x1x128xf32> to vector<1x16x128xf32>
    %12 = arith.mulf %8, %11 : vector<1x16x128xf32>
    %c0_18 = arith.constant 0 : index
    %c0_19 = arith.constant 0 : index
    %13 = vector.load %arg5[%c0_18, %c0_19] : memref<1x128xf32, #tpu.memory_space<vmem>>, vector<1x128xf32>
    %14 = vector.shape_cast %13 : vector<1x128xf32> to vector<1x1x128xf32>
    %15 = vector.broadcast %14 : vector<1x1x128xf32> to vector<1x16x128xf32>
    %16 = arith.addf %12, %15 : vector<1x16x128xf32>
    %cst_20 = arith.constant 0.000000e+00 : f32
    %17 = vector.broadcast %cst_20 : f32 to vector<1x16x128xf32>
    %18 = arith.maximumf %16, %17 : vector<1x16x128xf32>
    %c0_21 = arith.constant 0 : index
    %c1 = arith.constant 1 : index
    %c0_22 = arith.constant 0 : index
    %19 = vector.load %arg11[%c0_21, %c1, %c0_22] : memref<1x18x128xf32, #tpu.memory_space<vmem>>, vector<1x16x128xf32>
    tpu.vector_store %arg11[%c0_21, %c1, %c0_22], %18 {strides = array<i32>} : memref<1x18x128xf32, #tpu.memory_space<vmem>>, vector<1x16x128xf32>,
    %c0_23 = arith.constant 0 : index
    %c0_24 = arith.constant 0 : index
    %c0_25 = arith.constant 0 : index
    %20 = vector.load %arg11[%c0_23, %c0_24, %c0_25] : memref<1x18x128xf32, #tpu.memory_space<vmem>>, vector<1x16x128xf32>
    %c0_26 = arith.constant 0 : index
    %c1_27 = arith.constant 1 : index
    %c0_28 = arith.constant 0 : index
    %21 = vector.load %arg11[%c0_26, %c1_27, %c0_28] : memref<1x18x128xf32, #tpu.memory_space<vmem>>, vector<1x16x128xf32>
    %c0_29 = arith.constant 0 : index
    %c2 = arith.constant 2 : index
    %c0_30 = arith.constant 0 : index
    %22 = vector.load %arg11[%c0_29, %c2, %c0_30] : memref<1x18x128xf32, #tpu.memory_space<vmem>>, vector<1x16x128xf32>
    %23 = tpu.concatenate %20, %21, %22 in 2 : vector<1x16x128xf32>, vector<1x16x128xf32>, vector<1x16x128xf32> -> vector<1x16x384xf32>
    %24 = vector.shape_cast %23 : vector<1x16x384xf32> to vector<16x384xf32>
    %25 = arith.truncf %24 : vector<16x384xf32> to vector<16x384xbf16>
    %c0_31 = arith.constant 0 : index
    %c0_32 = arith.constant 0 : index
    %26 = vector.load %arg6[%c0_31, %c0_32] : memref<384x128xbf16, #tpu.memory_space<vmem>>, vector<384x128xbf16>
    %cst_33 = arith.constant dense<0.000000e+00> : vector<16x128xf32>
    %27 = tpu.matmul %25, %26, %cst_33 {dimension_numbers = #tpu.dot_dimension_numbers<[1], [0], [0], [1], [0, 0, 1, 1], [], []>} : vector<16x384xbf16>, vector<384x128xbf16>, vector<16x128xf32> -> vector<16x128xf32>
    %28 = vector.shape_cast %27 : vector<16x128xf32> to vector<1x16x128xf32>
    %c0_34 = arith.constant 0 : index
    %c0_35 = arith.constant 0 : index
    %c0_36 = arith.constant 0 : index
    %29 = vector.load %arg2[%c0_34, %c0_35, %c0_36] : memref<1x16x128xf32, #tpu.memory_space<vmem>>, vector<1x16x128xf32>
    %30 = arith.addf %28, %29 : vector<1x16x128xf32>
    %c0_37 = arith.constant 0 : index
    %c0_38 = arith.constant 0 : index
    %31 = vector.load %arg7[%c0_37, %c0_38] : memref<1x128xf32, #tpu.memory_space<vmem>>, vector<1x128xf32>
    %32 = vector.shape_cast %31 : vector<1x128xf32> to vector<1x1x128xf32>
    %33 = vector.broadcast %32 : vector<1x1x128xf32> to vector<1x16x128xf32>
    %34 = arith.mulf %30, %33 : vector<1x16x128xf32>
    %c0_39 = arith.constant 0 : index
    %c0_40 = arith.constant 0 : index
    %c0_41 = arith.constant 0 : index
    %35 = vector.load %arg3[%c0_39, %c0_40, %c0_41] : memref<1x1x128xf32, #tpu.memory_space<vmem>>, vector<1x1x128xf32>
    %36 = vector.broadcast %35 : vector<1x1x128xf32> to vector<1x16x128xf32>
    %37 = arith.addf %34, %36 : vector<1x16x128xf32>
    %cst_42 = arith.constant 0.000000e+00 : f32
    %38 = vector.broadcast %cst_42 : f32 to vector<1x16x128xf32>
    %39 = arith.maximumf %37, %38 : vector<1x16x128xf32>
    %c0_43 = arith.constant 0 : index
    %c1_44 = arith.constant 1 : index
    %c0_45 = arith.constant 0 : index
    %40 = vector.load %arg12[%c0_43, %c1_44, %c0_45] : memref<1x18x128xf32, #tpu.memory_space<vmem>>, vector<1x16x128xf32>
    tpu.vector_store %arg12[%c0_43, %c1_44, %c0_45], %39 {strides = array<i32>} : memref<1x18x128xf32, #tpu.memory_space<vmem>>, vector<1x16x128xf32>,
    %c0_46 = arith.constant 0 : index
    %c0_47 = arith.constant 0 : index
    %c0_48 = arith.constant 0 : index
    %41 = vector.load %arg12[%c0_46, %c0_47, %c0_48] : memref<1x18x128xf32, #tpu.memory_space<vmem>>, vector<1x16x128xf32>
    %c0_49 = arith.constant 0 : index
    %c1_50 = arith.constant 1 : index
    %c0_51 = arith.constant 0 : index
    %42 = vector.load %arg12[%c0_49, %c1_50, %c0_51] : memref<1x18x128xf32, #tpu.memory_space<vmem>>, vector<1x16x128xf32>
    %c0_52 = arith.constant 0 : index
    %c2_53 = arith.constant 2 : index
    %c0_54 = arith.constant 0 : index
    %43 = vector.load %arg12[%c0_52, %c2_53, %c0_54] : memref<1x18x128xf32, #tpu.memory_space<vmem>>, vector<1x16x128xf32>
    %44 = tpu.concatenate %41, %42, %43 in 2 : vector<1x16x128xf32>, vector<1x16x128xf32>, vector<1x16x128xf32> -> vector<1x16x384xf32>
    %45 = vector.shape_cast %44 : vector<1x16x384xf32> to vector<16x384xf32>
    %46 = arith.truncf %45 : vector<16x384xf32> to vector<16x384xbf16>
    %c0_55 = arith.constant 0 : index
    %c0_56 = arith.constant 0 : index
    %47 = vector.load %arg8[%c0_55, %c0_56] : memref<384x128xbf16, #tpu.memory_space<vmem>>, vector<384x128xbf16>
    %cst_57 = arith.constant dense<0.000000e+00> : vector<16x128xf32>
    %48 = tpu.matmul %46, %47, %cst_57 {dimension_numbers = #tpu.dot_dimension_numbers<[1], [0], [0], [1], [0, 0, 1, 1], [], []>} : vector<16x384xbf16>, vector<384x128xbf16>, vector<16x128xf32> -> vector<16x128xf32>
    %c0_58 = arith.constant 0 : index
    %c0_59 = arith.constant 0 : index
    %49 = vector.load %arg9[%c0_58, %c0_59] : memref<1x128xf32, #tpu.memory_space<vmem>>, vector<1x128xf32>
    %50 = vector.broadcast %49 : vector<1x128xf32> to vector<16x128xf32>
    %51 = arith.addf %48, %50 : vector<16x128xf32>
    %52 = vector.shape_cast %51 : vector<16x128xf32> to vector<1x16x128xf32>
    %c0_60 = arith.constant 0 : index
    %c0_61 = arith.constant 0 : index
    %c0_62 = arith.constant 0 : index
    %53 = vector.load %arg10[%c0_60, %c0_61, %c0_62] : memref<1x16x128xf32, #tpu.memory_space<vmem>>, vector<1x16x128xf32>
    tpu.vector_store %arg10[%c0_60, %c0_61, %c0_62], %52 {strides = array<i32>} : memref<1x16x128xf32, #tpu.memory_space<vmem>>, vector<1x16x128xf32>,
    return
  }
  func.func @transform_0(%arg0: i32) -> (i32, i32, i32) {
    %c0_i32 = arith.constant 0 : i32
    %c0_i32_0 = arith.constant 0 : i32
    %c0_i32_1 = arith.constant 0 : i32
    return %arg0, %c0_i32, %c0_i32_0 : i32, i32, i32
  }
  func.func @transform_1(%arg0: i32) -> (i32, i32, i32) {
    %c0_i32 = arith.constant 0 : i32
    %c0_i32_0 = arith.constant 0 : i32
    %c0_i32_1 = arith.constant 0 : i32
    return %arg0, %c0_i32, %c0_i32_0 : i32, i32, i32
  }
  func.func @transform_2(%arg0: i32) -> (i32, i32, i32) {
    %c0_i32 = arith.constant 0 : i32
    %c0_i32_0 = arith.constant 0 : i32
    %c0_i32_1 = arith.constant 0 : i32
    return %arg0, %c0_i32, %c0_i32_0 : i32, i32, i32
  }
  func.func @transform_3(%arg0: i32) -> (i32, i32) {
    %c0_i32 = arith.constant 0 : i32
    %c0_i32_0 = arith.constant 0 : i32
    %c0_i32_1 = arith.constant 0 : i32
    return %c0_i32, %c0_i32_0 : i32, i32
  }
  func.func @transform_4(%arg0: i32) -> (i32, i32) {
    %c0_i32 = arith.constant 0 : i32
    %c0_i32_0 = arith.constant 0 : i32
    %c0_i32_1 = arith.constant 0 : i32
    return %c0_i32, %c0_i32_0 : i32, i32
  }
  func.func @transform_5(%arg0: i32) -> (i32, i32) {
    %c0_i32 = arith.constant 0 : i32
    %c0_i32_0 = arith.constant 0 : i32
    %c0_i32_1 = arith.constant 0 : i32
    return %c0_i32, %c0_i32_0 : i32, i32
  }
  func.func @transform_6(%arg0: i32) -> (i32, i32) {
    %c0_i32 = arith.constant 0 : i32
    %c0_i32_0 = arith.constant 0 : i32
    %c0_i32_1 = arith.constant 0 : i32
    return %c0_i32, %c0_i32_0 : i32, i32
  }
  func.func @transform_7(%arg0: i32) -> (i32, i32) {
    %c0_i32 = arith.constant 0 : i32
    %c0_i32_0 = arith.constant 0 : i32
    %c0_i32_1 = arith.constant 0 : i32
    return %c0_i32, %c0_i32_0 : i32, i32
  }
  func.func @transform_8(%arg0: i32) -> (i32, i32) {
    %c0_i32 = arith.constant 0 : i32
    %c0_i32_0 = arith.constant 0 : i32
    %c0_i32_1 = arith.constant 0 : i32
    return %c0_i32, %c0_i32_0 : i32, i32
  }
  func.func @transform_9(%arg0: i32) -> (i32, i32, i32) {
    %c0_i32 = arith.constant 0 : i32
    %c0_i32_0 = arith.constant 0 : i32
    %c0_i32_1 = arith.constant 0 : i32
    return %arg0, %c0_i32, %c0_i32_0 : i32, i32, i32
  }
}

</mosaic_0001>

<bundles_post_ra>
// kernel: tpu_custom_call.1
= control target key start
LH: loop header
LB: loop body
LE: loop exit
PB: predicated region body
PF: predicated region fallthrough
CT: control target
= control target key end

     0   :  { %s2114_s0 = inlined_call_operand.hbm [shape: f32[2,16,128], index: 0, kind: input, shape index: {}]   ;;  %s2115_s1 = inlined_call_operand.hbm [shape: f32[2,16,128], index: 1, kind: input, shape index: {}]   ;;  %s2116_s2 = inlined_call_operand.vmem [shape: f32[2,1,128], index: 2, kind: input, shape index: {}]   ;;  %s2117_s3 = inlined_call_operand.vmem [shape: f32[1,128], index: 3, kind: input, shape index: {}]   ;;  %s2118_s4 = inlined_call_operand.vmem [shape: f32[1,128], index: 4, kind: input, shape index: {}]   ;;  %s2119_s5 = inlined_call_operand.hbm [shape: bf16[384,128], index: 5, kind: input, shape index: {}]   ;;  %s2120_s6 = inlined_call_operand.vmem [shape: f32[1,128], index: 6, kind: input, shape index: {}]   ;;  %s2121_s7 = inlined_call_operand.hbm [shape: bf16[384,128], index: 7, kind: input, shape index: {}]   ;;  %s2122_s8 = inlined_call_operand.vmem [shape: f32[1,128], index: 8, kind: input, shape index: {}]   ;;  %s2123_s9 = inlined_call_operand.hbm [shape: f32[2,16,128], index: 9, kind: output, shape index: {}]  }
   0x1   :  { %2130 = sst [smem:[#allocation21_spill]] %s2114_s0 }
   0x2   :  { %2131 = sst [smem:[#allocation22_spill]] %s2119_s5 }
   0x3   :  { %2132 = sst [smem:[#allocation23_spill]] %s2121_s7 }
   0x4   :  { %14 = vsyncpa [#allocation5], 0 }
   0x5   :  { %16 = vsyncpa [#allocation5 + $0x1], 0 }
   0x6   :  { %17 = vsyncpa [#allocation8], 0 }
   0x7   :  { %19 = vsyncpa [#allocation8 + $0x1], 0 }
   0x8   :  { %20 = vsyncpa [#allocation11], 0 }
   0x9   :  { %21 = vsyncpa [#allocation6], 0 }
   0xa   :  { %23 = vsyncpa [#allocation6 + $0x1], 0  ;;  %s1769_s30 = smov 0   ;;  %s1771_s10 = smov 0  }
   0xb   :  { %s1773_s11 = smov 0   ;;  %s1775_s12 = smov 0  }
   0xc LB: > { %2133 = sst [smem:[#allocation18_spill]] %s1700_s11  ;;  %s1790_s13 = sadd.s32 4294967295, %s1704_s12   ;;  %s1704_s12 = sphi %s1775_s12, %s2160_s12   ;;  %s1700_s11 = sphi %s1773_s11, %s2157_s11   ;;  %s1696_s10 = sphi %s1771_s10, %s2159_s10   ;;  %s1692_s30 = sphi %s1769_s30, %s2158_s30  }
   0xd   : > { %s1202_s14 = sadd.s32 4294967294, %s1704_s12   ;;  %p49_p0 = scmp.ne.s32.totalorder %s1696_s10, %s1692_s30 }
   0xe   : > { %p2124_p1 = scmp.eq.s32.totalorder %s1790_s13, 0  ;;  %p257_p3 = scmp.eq.s32.totalorder %s1202_s14, 1 }
   0xf   : > { %p1203_p5 = scmp.ge.s32.totalorder %s1704_s12, 1  ;;  %p264_p7 = scmp.lt.s32.totalorder %s1704_s12, 3 }
  0x10   : > { %p1799_p4 = por %p2124_p1, %p49_p0  ;;  %p1804_p6 = por %p257_p3, %p49_p0 }
  0x11   : > { %p1809_p8 = pnand %p1203_p5, %p264_p7  ;;  %s1706_s18 = smov [#allocation9]  }
  0x12   : > { %s2134_s15 = scalar_select %p1799_p4, 1, 0 }
  0x13   : > { %s2135_s16 = scalar_select %p1804_p6, 1, 0 }
  0x14   : > { %s282_s19 = sshll.u32 %s1706_s18, 4  ;;  %p1396_p9 = pneg %p1809_p8  ;;  %s1813_s19 = int_to_ptr.vmem [resolvable:$true] %s282_s19 }
  0x15   : > { %2136 = sst [smem:[#allocation19_spill]] %s2135_s16  ;;  %s1707_s21 = smov [#allocation10]  }
  0x16   : > { %p1820_p11 = pnand %p1396_p9, %p2124_p1  ;;  %s298_s22 = sshll.u32 %s1707_s21, 4  ;;  %s1824_s22 = int_to_ptr.vmem [resolvable:$true] %s298_s22 }
  0x17   : > { %s2139_s5 = sld [smem:[#allocation22_spill]] }
  0x18   : > { %p1512_p13 = pneg %p1820_p11 }
  0x1d   : > { %s1510_s25 = scalar_lea.hbm %s2139_s5, 3072 }
  0x1e   : > { %p1511_p12 = scmp.ne.s32.totalorder %s2139_s5, %s1510_s25  ;;  %p1517_p5 = scmp.lt.u32.totalorder %s1510_s25, %s2139_s5 }
  0x20   : > { %p1513_p0 = pnand %p1512_p13, %p1511_p12 }
  0x22   : > { %p1514_p3 = pneg %p1513_p0 }
  0x24   : > { %p1519_p7 = pnand %p1517_p5, %p1514_p3 }
  0x26   : > { %1522 = shalt.err (!%p1519_p7)
}
  0x27   : > { %s1523_s14 = scalar_lea.vmem %s1813_s19, 3072  ;;  %p1531_p2 = scmp.lt.s32.totalorder %s1813_s19, %s1813_s19 }
  0x28   : > { %p1524_p9 = scmp.ne.s32.totalorder %s1813_s19, %s1523_s14  ;;  %p1532_p12 = scmp.lt.s32.totalorder %s1523_s14, %s1523_s14 }
  0x2a   : > { %p1526_p10 = pnand %p1524_p9, %p1512_p13  ;;  %p1533_p0 = por %p1532_p12, %p1531_p2 }
  0x2c   : > { %p1527_p1 = pneg %p1526_p10 }
  0x2e   : > { %p1534_p6 = pnand %p1533_p0, %p1527_p1 }
  0x30   : > { %1537 = shalt.err (!%p1534_p6)
}
  0x31   : > { %s1708_s18 = smov 64   ;;  %s1709_s21 = smov 4  }
  0x32   : > { %1399 = dma.hbm_to_vmem [thread:$0]  (!%p1820_p11), %s2139_s5, 3072, %s1813_s19, [#allocation8], %s1708_s18, %s1708_s18, %s1709_s21  }
  0x33   : > { %s2140_s7 = sld [smem:[#allocation23_spill]] }
  0x39   : > { %s1538_s27 = scalar_lea.hbm %s2140_s7, 3072 }
  0x3a   : > { %p1539_p2 = scmp.ne.s32.totalorder %s2140_s7, %s1538_s27  ;;  %p1545_p10 = scmp.lt.u32.totalorder %s1538_s27, %s2140_s7 }
  0x3c   : > { %p1541_p1 = pnand %p1539_p2, %p1512_p13 }
  0x3e   : > { %p1542_p6 = pneg %p1541_p1 }
  0x40   : > { %p1547_p3 = pnand %p1545_p10, %p1542_p6 }
  0x42   : > { %1550 = shalt.err (!%p1547_p3)
}
  0x43   : > { %s1551_s19 = scalar_lea.vmem %s1824_s22, 3072  ;;  %p1559_p12 = scmp.lt.s32.totalorder %s1824_s22, %s1824_s22 }
  0x44   : > { %p1552_p5 = scmp.ne.s32.totalorder %s1824_s22, %s1551_s19  ;;  %p1560_p0 = scmp.lt.s32.totalorder %s1551_s19, %s1551_s19 }
  0x46   : > { %p1554_p7 = pnand %p1552_p5, %p1512_p13  ;;  %p1561_p2 = por %p1560_p0, %p1559_p12 }
  0x48   : > { %p1555_p9 = pneg %p1554_p7 }
  0x4a   : > { %p1562_p1 = pnand %p1561_p2, %p1555_p9 }
  0x4c   : > { %1565 = shalt.err (!%p1562_p1)
}
  0x4d   : > { %1402 = dma.hbm_to_vmem [thread:$0]  (!%p1820_p11), %s2140_s7, 3072, %s1824_s22, [#allocation11], %s1708_s18, %s1708_s18, %s1709_s21  }
  0x4e   : > { %s1879_s24 = sadd.s32 1, %s1704_s12   ;;  %s36_s20 = sadd.s32 1, %s1700_s11 }
  0x4f   : > { %s33_s25 = ssub.s32 %s1704_s12, %s1879_s24  ;;  %p43_p13 = scmp.ne.s32.totalorder %s1700_s11, %s1696_s10 }
  0x50   : > { %p34_p6 = scmp.eq.s32.totalorder %s33_s25, 0  ;;  %p44_p10 = scmp.eq.s32.totalorder %s1704_s12, 0 }
  0x51   : > { %p2141_p3 = scmp.eq.s32.totalorder %s1790_s13, 1  ;;  %p1416_p7 = scmp.lt.s32.totalorder %s1704_s12, 2 }
  0x52   : > { %s1895_s27 = scalar_select %p34_p6, %s1700_s11, %s36_s20  }
  0x53   : > { %p1889_p5 = por %p2141_p3, %p43_p13  ;;  %p45_p9 = por %p44_p10, %p43_p13 }
  0x54   : > { %2143 = sst [smem:[#allocation20_spill]] %s1895_s27  ;;  %s315_s28 = sand.u32 1, %s1700_s11  }
  0x55   : > { %s2142_s26 = scalar_select %p1889_p5, 1, 0 }
  0x56   : > { %s1898_s29 = sshll.u32 %s315_s28, 4  ;;  %s2126_s22 = sshll.u32 %s1704_s12, 8 }
  0x57   : > { %s2144_s0 = sld [smem:[#allocation21_spill]]  ;;  %s319_s19 = scalar_lea.vmem [#allocation4], %s1898_s29 }
  0x58   : > { %s326_s16 = sshll.u32 %s319_s19, 4  ;;  %p1911_p11 = pnand %p1416_p7, %p45_p9  ;;  %s1909_s16 = int_to_ptr.vmem [resolvable:$true] %s326_s16 }
  0x59   : > { %s1915_s20 = scalar_lea.sflag [#allocation5], %s315_s28 }
  0x5a   : > { %p1568_p0 = pneg %p1911_p11 }
  0x5d   : > { %s1906_s14 = scalar_lea.hbm %s2144_s0, %s2126_s22  ;;  %s1571_s19 = scalar_lea.hbm %s2144_s0, 512 }
  0x5e   : > { %s1566_s25 = scalar_lea.hbm %s1906_s14, 256  ;;  %p1572_p13 = scmp.lt.u32.totalorder %s1906_s14, %s2144_s0 }
  0x5f   : > { %p1567_p12 = scmp.ne.s32.totalorder %s1906_s14, %s1566_s25  ;;  %p1573_p6 = scmp.lt.u32.totalorder %s1571_s19, %s1566_s25 }
  0x60   : > { %p1575_p3 = scmp.lt.u32.totalorder %s1566_s25, %s1906_s14 }
  0x61   : > { %p1569_p2 = pnand %p1568_p0, %p1567_p12  ;;  %p1574_p10 = por %p1573_p6, %p1572_p13 }
  0x63   : > { %p1570_p1 = pneg %p1569_p2  ;;  %p1576_p7 = por %p1575_p3, %p1574_p10 }
  0x65   : > { %p1577_p9 = pnand %p1576_p7, %p1570_p1 }
  0x67   : > { %1580 = shalt.err (!%p1577_p9)
}
  0x68   : > { %s1581_s28 = scalar_lea.vmem %s1909_s16, 256  ;;  %s1710_s18 = smov [#allocation4]  }
  0x69   : > { %p1582_p12 = scmp.ne.s32.totalorder %s1909_s16, %s1581_s28  ;;  %s1586_s21 = sshll.u32 %s1710_s18, 4  ;;  %s1587_s21 = int_to_ptr.vmem [resolvable:$false] %s1586_s21 }
  0x6a   : > { %s1588_s5 = scalar_lea.vmem %s1587_s21, 512  ;;  %p1589_p4 = scmp.lt.s32.totalorder %s1909_s16, %s1587_s21 }
  0x6b   : > { %p1584_p2 = pnand %p1582_p12, %p1568_p0  ;;  %p1590_p13 = scmp.lt.s32.totalorder %s1588_s5, %s1581_s28 }
  0x6d   : > { %p1585_p5 = pneg %p1584_p2  ;;  %p1591_p6 = por %p1590_p13, %p1589_p4 }
  0x6f   : > { %p1592_p10 = pnand %p1591_p6, %p1585_p5 }
  0x71   : > { %1595 = shalt.err (!%p1592_p10)
}
  0x72   : > { %s1711_s22 = smov 128   ;;  %s1712_s25 = smov 8  }
  0x73   : > { %1406 = dma.hbm_to_vmem [thread:$0]  (!%p1911_p11), %s1906_s14, 256, %s1909_s16, %s1915_s20, %s1711_s22, %s1711_s22, %s1712_s25  }
  0x74   : > { %s2146_s19 = sshll.u32 %s1704_s12, 8  ;;  %s340_s5 = scalar_lea.vmem [#allocation7], %s1898_s29 }
  0x75   : > { %s1951_s21 = scalar_lea.hbm %s2115_s1, %s2146_s19  ;;  %s347_s0 = sshll.u32 %s340_s5, 4  ;;  %s1954_s0 = int_to_ptr.vmem [resolvable:$true] %s347_s0 }
  0x76   : > { %s336_s7 = sand.u32 1, %s1704_s12   ;;  %s1596_s11 = scalar_lea.hbm %s1951_s21, 256 }
  0x77   : > { %s1957_s27 = scalar_lea.sflag [#allocation8], %s336_s7  ;;  %p1597_p4 = scmp.ne.s32.totalorder %s1951_s21, %s1596_s11 }
  0x78   : > { %s1601_s20 = scalar_lea.hbm %s2115_s1, 512  ;;  %p1602_p3 = scmp.lt.u32.totalorder %s1951_s21, %s2115_s1 }
  0x79   : > { %p1599_p5 = pnand %p1597_p4, %p1568_p0  ;;  %p1603_p7 = scmp.lt.u32.totalorder %s1601_s20, %s1596_s11 }
  0x7a   : > { %p1605_p12 = scmp.lt.u32.totalorder %s1596_s11, %s1951_s21 }
  0x7b   : > { %p1600_p1 = pneg %p1599_p5  ;;  %p1604_p9 = por %p1603_p7, %p1602_p3 }
  0x7d   : > { %p1606_p2 = por %p1605_p12, %p1604_p9 }
  0x7f   : > { %p1607_p13 = pnand %p1606_p2, %p1600_p1 }
  0x81   : > { %1610 = shalt.err (!%p1607_p13)
}
  0x82   : > { %s1611_s7 = scalar_lea.vmem %s1954_s0, 256  ;;  %s1713_s29 = smov [#allocation7]  }
  0x83   : > { %p1612_p6 = scmp.ne.s32.totalorder %s1954_s0, %s1611_s7  ;;  %s1616_s18 = sshll.u32 %s1713_s29, 4  ;;  %s1617_s18 = int_to_ptr.vmem [resolvable:$false] %s1616_s18 }
  0x84   : > { %s1618_s5 = scalar_lea.vmem %s1617_s18, 512  ;;  %p1619_p5 = scmp.lt.s32.totalorder %s1954_s0, %s1617_s18 }
  0x85   : > { %p1614_p10 = pnand %p1612_p6, %p1568_p0  ;;  %p1620_p3 = scmp.lt.s32.totalorder %s1618_s5, %s1611_s7 }
  0x87   : > { %p1615_p4 = pneg %p1614_p10  ;;  %p1621_p7 = por %p1620_p3, %p1619_p5 }
  0x89   : > { %p1622_p9 = pnand %p1621_p7, %p1615_p4 }
  0x8b   : > { %1625 = shalt.err (!%p1622_p9)
}
  0x8c   : > { %1409 = dma.hbm_to_vmem [thread:$0]  (!%p1911_p11), %s1951_s21, 256, %s1954_s0, %s1957_s27, %s1711_s22, %s1711_s22, %s1712_s25  }
  0x8d   : > { %365 = sbr.rel (%p1809_p8) target bundleno = 666 (0x29a), region = 56  ;;  %s1989_s11 = sand.u32 (!%p1809_p8), 1, %s1696_s10  }
  0x8e   : > { %s1992_s14 = sshll.u32 (!%p1809_p8), %s1989_s11, 4  ;;  %s368_s23 = scalar_lea.sflag (!%p1809_p8), [#allocation5], %s1989_s11 }
  0x8f   : > { %s371_s16 = scalar_lea.vmem (!%p1809_p8), [#allocation4], %s1992_s14  ;;  %p2147_p0 = scmp.ne.s32.totalorder (!%p1809_p8), %s2134_s15, 0 }
  0x94   : > { %1671 = dma.done.wait (%p2147_p0), %s368_s23, 256  }
  0x95   : > { %1673 = vsyncadd (%p2147_p0), %s368_s23, 4294967040  ;;  %s376_s0 = sand.u32 1, %s1790_s13   ;;  %s380_s27 = scalar_lea.vmem [#allocation7], %s1992_s14 }
  0x96   : > { %s377_s17 = scalar_lea.sflag [#allocation8], %s376_s0 }
  0x97   : > { %1675 = dma.done.wait (%p2147_p0), %s377_s17, 256  }
  0x98   : > { %1677 = vsyncadd (%p2147_p0), %s377_s17, 4294967040  ;;  %p2148_p8 = scmp.eq.s32.totalorder %s1790_s13, 0 }
  0x9a   : > { %1679 = dma.done.wait (%p2148_p8), [#allocation8], 3072   ;;  %p2149_p11 = pmov %p2148_p8 }
  0x9b   : > { %p2150_p1 = pmov %p2148_p8 }
  0x9c   : > { %1681 = vsyncadd (%p2149_p11), [#allocation8], 4294964224 }
  0x9d   : > { %1683 = dma.done.wait (%p2150_p1), [#allocation11], 3072   ;;  %p2151_p12 = pmov %p2150_p1 }
  0x9e   : > { %v1714_v0 = vmov 0.0   ;;  %vm1715_vm0 = vmmov 0   ;;  %v1462_v1 = vld [vmem:[#allocation9 + $0x40] sm:$0xff]   ;;  %v1465_v4 = vld [vmem:[#allocation9 + $0x48] sm:$0xff]   ;;  %v1468_v7 = vld [vmem:[#allocation9 + $0x50] sm:$0xff]   ;;  %p431_p2 = scmp.lt.s32.totalorder %s1790_s13, 1 }
  0x9f   : > { %1685 = vsyncadd (%p2151_p12), [#allocation11], 4294964224  ;;  %1342 = vmatprep.subr.bf16.mxu1 %v1714_v0  ;;  %435 = vst [vmem:[#allocation2] sm:$0x1] %v1714_v0  ;;  %1358 = vmatprep.mubr.msk.bf16.mxu1 %vm1715_vm0, %v1714_v0  ;;  %v1463_v2 = vld [vmem:[#allocation9] sm:$0xff]   ;;  %v1466_v5 = vld [vmem:[#allocation9 + $0x8] sm:$0xff]  }
  0xa0   : > { %436 = vst [vmem:[#allocation2 + $0x11] sm:$0x1] %v1714_v0  ;;  %437 = vst [vmem:[#allocation3] sm:$0x1] %v1714_v0  ;;  %1280 = vmatprep.subr.bf16.mxu0 %v1462_v1  ;;  %v1464_v3 = vld [vmem:[#allocation9 + $0x80] sm:$0xff]   ;;  %v1467_v6 = vld [vmem:[#allocation9 + $0x88] sm:$0xff]  }
  0xa1   : > { %438 = vst [vmem:[#allocation3 + $0x11] sm:$0x1] %v1714_v0  ;;  %1281 = vmatpush3.bf16.msra.mxu0 %v1463_v2  ;;  %1343 = vmatpush3.bf16.msra.mxu1 %v1464_v3  ;;  %v1469_v8 = vld [vmem:[#allocation9 + $0x10] sm:$0xff]   ;;  %v1471_v10 = vld [vmem:[#allocation9 + $0x58] sm:$0xff]   ;;  %v1474_v13 = vld [vmem:[#allocation9 + $0x60] sm:$0xff]   ;;  %s432_s20 = scalar_select %p431_p2, %s1790_s13, 1 }
  0xa2   : > { %1282 = vmatprep.subr.bf16.mxu0 %v1465_v4  ;;  %1344 = vmatprep.subr.bf16.mxu1 %v1714_v0  ;;  %v1470_v9 = vld [vmem:[#allocation9 + $0x90] sm:$0xff]   ;;  %v1472_v11 = vld [vmem:[#allocation9 + $0x18] sm:$0xff]   ;;  %v1475_v14 = vld [vmem:[#allocation9 + $0x20] sm:$0xff]   ;;  %s1279_s17 = sshll.u32 %s1790_s13, 8  ;;  %p2152_p6 = scmp.ne.s32.totalorder %s2142_s26, 0 }
  0xa3   : > { %v1473_v12 = vld [vmem:[#allocation9 + $0x98] sm:$0xff]   ;;  %v1476_v15 = vld [vmem:[#allocation9 + $0xa0] sm:$0xff]   ;;  %v1477_v16 = vld [vmem:[#allocation9 + $0x68] sm:$0xff]   ;;  %s433_s7 = scalar_lea.vmem %s2116_s2, %s432_s20  ;;  %s2070_s22 = scalar_lea.hbm %s2123_s9, %s1279_s17 }
  0xa4   : > { %v1478_v17 = vld [vmem:[#allocation9 + $0x28] sm:$0xff]   ;;  %v1480_v19 = vld [vmem:[#allocation9 + $0x70] sm:$0xff]   ;;  %v1483_v22 = vld [vmem:[#allocation9 + $0x78] sm:$0xff]   ;;  %s1716_s13 = smov [#allocation12]  }
  0xa5   : > { %1283 = vmatpush3.bf16.msra.mxu0 %v1466_v5  ;;  %1345 = vmatpush3.bf16.msra.mxu1 %v1467_v6  ;;  %v1479_v18 = vld [vmem:[#allocation9 + $0xa8] sm:$0xff]   ;;  %v1481_v20 = vld [vmem:[#allocation9 + $0x30] sm:$0xff]   ;;  %v1484_v29 = vld [vmem:[#allocation9 + $0x38] sm:$0xff]   ;;  %s1630_s21 = sshll.u32 %s1716_s13, 4  ;;  %s1631_s21 = int_to_ptr.vmem [resolvable:$false] %s1630_s21 }
  0xa6   : > { %1284 = vmatprep.subr.bf16.mxu0 %v1468_v7  ;;  %1346 = vmatprep.subr.bf16.mxu1 %v1714_v0  ;;  %v1482_v21 = vld [vmem:[#allocation9 + $0xb0] sm:$0xff]   ;;  %v440_v24 = vld [vmem:[%s371_s16 + $0x8] sm:$0xff]  ;;  %v1486_v33 = vld [vmem:[#allocation10 + $0x40] sm:$0xff]   ;;  %s1632_s20 = scalar_lea.vmem %s1631_s21, 512 }
  0xa7   : > { %v439_v23 = vld [vmem:[%s371_s16] sm:$0xff]  ;;  %v1485_v30 = vld [vmem:[#allocation9 + $0xb8] sm:$0xff]   ;;  %v1489_v39 = vld [vmem:[#allocation10 + $0x48] sm:$0xff]   ;;  %s430_s16 = scalar_lea.vmem [#allocation12], %s1992_s14  ;;  %s1065_s14 = scalar_lea.sflag [#allocation6], %s1989_s11 }
  0xa8   : > { %v1219_v25 = vld [vmem:[%s2117_s3] ss:$0 sm:$0xff]  ;;  %v1488_v37 = vld [vmem:[#allocation10] sm:$0xff]   ;;  %v1490_v46 = vld [vmem:[#allocation10 + $0x88] sm:$0xff]   ;;  %s1078_s0 = sshll.u32 %s430_s16, 4  ;;  %s2065_s0 = int_to_ptr.vmem [resolvable:$true] %s1078_s0 }
  0xa9   : > { %1285 = vmatpush3.bf16.msra.mxu0 %v1469_v8  ;;  %1347 = vmatpush3.bf16.msra.mxu1 %v1470_v9  ;;  %v448_v26 = vmul.f32 %v1219_v25, %v439_v23  ;;  %v449_v27 = vmul.f32 %v1219_v25, %v440_v24  ;;  %v1220_v28 = vld [vmem:[%s2118_s4] ss:$0 sm:$0xff]  ;;  %v1487_v38 = vld [vmem:[#allocation10 + $0x80] sm:$0xff]   ;;  %v1491_v47 = vld [vmem:[#allocation10 + $0x8] sm:$0xff]   ;;  %s1626_s25 = scalar_lea.vmem %s2065_s0, 256  ;;  %p1633_p5 = scmp.lt.s32.totalorder %s2065_s0, %s1631_s21 }
  0xaa   : > { %1286 = vmatprep.subr.bf16.mxu0 %v1471_v10  ;;  %1348 = vmatprep.subr.bf16.mxu1 %v1714_v0  ;;  %v1492_v48 = vld [vmem:[#allocation10 + $0x50] sm:$0xff]   ;;  %v1495_v51 = vld [vmem:[#allocation10 + $0x58] sm:$0xff]   ;;  %v1498_v54 = vld [vmem:[#allocation10 + $0x60] sm:$0xff]   ;;  %p1627_p13 = scmp.ne.s32.totalorder %s2065_s0, %s1626_s25  ;;  %p1634_p3 = scmp.lt.s32.totalorder %s1632_s20, %s1626_s25 }
  0xab   : > { %v457_v31 = vadd.f32 %v1220_v28, %v448_v26  ;;  %v458_v32 = vadd.f32 %v1220_v28, %v449_v27  ;;  %v1493_v49 = vld [vmem:[#allocation10 + $0x90] sm:$0xff]   ;;  %v1496_v52 = vld [vmem:[#allocation10 + $0x98] sm:$0xff]   ;;  %v1499_v55 = vld [vmem:[#allocation10 + $0xa0] sm:$0xff]  }
  0xac   : > { %v1494_v50 = vld [vmem:[#allocation10 + $0x10] sm:$0xff]   ;;  %v1497_v53 = vld [vmem:[#allocation10 + $0x18] sm:$0xff]   ;;  %v1500_v56 = vld [vmem:[#allocation10 + $0x20] sm:$0xff]   ;;  %p1628_p10 = pnand %p1627_p13, %p2152_p6  ;;  %p1635_p7 = por %p1634_p3, %p1633_p5 }
  0xad   : > { %1287 = vmatpush3.bf16.msra.mxu0 %v1472_v11  ;;  %1349 = vmatpush3.bf16.msra.mxu1 %v1473_v12  ;;  %v459_v34 = vmax.f32 %v457_v31, 0.0  ;;  %v460_v35 = vmax.f32 %v458_v32, 0.0  ;;  %v1501_v57 = vld [vmem:[#allocation10 + $0x68] sm:$0xff]   ;;  %v1504_v60 = vld [vmem:[#allocation10 + $0x70] sm:$0xff]   ;;  %v1507_v63 = vld [vmem:[#allocation10 + $0x78] sm:$0xff]  }
  0xae   : > { %1288 = vmatprep.subr.bf16.mxu0 %v1474_v13  ;;  %1350 = vmatprep.subr.bf16.mxu1 %v1714_v0  ;;  %v1502_v58 = vld [vmem:[#allocation10 + $0xa8] sm:$0xff]   ;;  %v1505_v61 = vld [vmem:[#allocation10 + $0xb0] sm:$0xff]   ;;  %v1508_v1 = vld [vmem:[#allocation10 + $0xb8] sm:$0xff]   ;;  %p1629_p4 = pneg %p1628_p10 }
  0xaf   : > { %461 = vst [vmem:[#allocation2 + $0x1] sm:$0xff] %v459_v34  ;;  %462 = vst [vmem:[#allocation2 + $0x9] sm:$0xff] %v460_v35  ;;  %v470_v36 = vpack.c.bf16 %v460_v35, %v459_v34  ;;  %v1503_v59 = vld [vmem:[#allocation10 + $0x28] sm:$0xff]   ;;  %v1506_v62 = vld [vmem:[#allocation10 + $0x30] sm:$0xff]  }
  0xb0   : > { %v1509_v2 = vld [vmem:[#allocation10 + $0x38] sm:$0xff]   ;;  %v746_v9 = vld [vmem:[%s380_s27] sm:$0xff]  ;;  %p1636_p9 = pnand %p1635_p7, %p1629_p4 }
  0xb1   : > { %1289 = vmatpush3.bf16.msra.mxu0 %v1475_v14  ;;  %1351 = vmatpush3.bf16.msra.mxu1 %v1476_v15  ;;  %v1245_v14 = vld [vmem:[%s2120_s6] ss:$0 sm:$0xff]  ;;  %v747_v15 = vld [vmem:[%s380_s27 + $0x8] sm:$0xff] }
  0xb2   : > { %1290 = vmatprep.subr.bf16.mxu0 %v1477_v16  ;;  %1352 = vmatprep.subr.bf16.mxu1 %v1714_v0 }
  0xb3   : > { %696 = vmatprep.mubr.bf16.mxu0 %v470_v36  ;;  %v1247_v36 = vld [vmem:[%s2122_s8] ss:$0 sm:$0xff] }
  0xb5   : > { %1291 = vmatpush3.bf16.msra.mxu0 %v1478_v17  ;;  %1353 = vmatpush3.bf16.msra.mxu1 %v1479_v18  ;;  %v1246_v18 = vld [vmem:[%s433_s7] ss:$0 sm:$0xff] }
  0xb6   : > { %1292 = vmatprep.subr.bf16.mxu0 %v1480_v19  ;;  %1354 = vmatprep.subr.bf16.mxu1 %v1714_v0  ;;  %v463_v40 = vld [vmem:[#allocation2] sm:$0xff]  ;;  %v464_v41 = vld [vmem:[#allocation2 + $0x8] sm:$0xff] }
  0xb7   : > { %v467_v42 = vld [vmem:[#allocation2 + $0x2] sm:$0xff]  ;;  %v469_v43 = vpack.c.bf16 %v464_v41, %v463_v40  ;;  %v468_v44 = vld [vmem:[#allocation2 + $0xa] sm:$0xff] }
  0xb8   : > { %v471_v45 = vpack.c.bf16 %v468_v44, %v467_v42 }
  0xb9   : > { %1293 = vmatpush3.bf16.msra.mxu0 %v1481_v20  ;;  %1355 = vmatpush3.bf16.msra.mxu1 %v1482_v21 }
  0xba   : > { %1294 = vmatprep.subr.bf16.mxu0 %v1483_v22  ;;  %1356 = vmatprep.subr.bf16.mxu1 %v1714_v0 }
  0xbd   : > { %1295 = vmatpush3.bf16.msra.mxu0 %v1484_v29  ;;  %1357 = vmatpush3.bf16.msra.mxu1 %v1485_v30 }
  0xbe   : > { %1311 = vmatprep.subr.bf16.mxu0 %v1486_v33  ;;  %1362 = vmatprep.subr.bf16.mxu1 %v1714_v0 }
  0xc0   : > { %697 = vmatmul.mubr.bf16.vlgmr.msra.gmra.mrb[0].mxu0 %v469_v43  ;;  %1359 = vmatmul.mubr.bf16.vlgmr.msra.gmra.mrb[0].mxu1 %v471_v45 }
  0xc1   : > { %1312 = vmatpush3.bf16.msra.mxu0 %v1488_v37  ;;  %1363 = vmatpush3.bf16.msra.mxu1 %v1487_v38 }
  0xc2   : > { %1313 = vmatprep.subr.bf16.mxu0 %v1489_v39  ;;  %1364 = vmatprep.subr.bf16.mxu1 %v1714_v0 }
  0xc3   : > { %1378 = vmatprep.mubr.msk.bf16.mxu1 %vm1715_vm0, %v1714_v0 }
  0xc5   : > { %1365 = vmatpush3.bf16.msra.mxu1 %v1490_v46  ;;  %1314 = vmatpush3.bf16.msra.mxu0 %v1491_v47 }
  0xc6   : > { %1366 = vmatprep.subr.bf16.mxu1 %v1714_v0  ;;  %1315 = vmatprep.subr.bf16.mxu0 %v1492_v48 }
  0xc9   : > { %1367 = vmatpush3.bf16.msra.mxu1 %v1493_v49  ;;  %1316 = vmatpush3.bf16.msra.mxu0 %v1494_v50 }
  0xca   : > { %1368 = vmatprep.subr.bf16.mxu1 %v1714_v0  ;;  %1317 = vmatprep.subr.bf16.mxu0 %v1495_v51 }
  0xcd   : > { %1369 = vmatpush3.bf16.msra.mxu1 %v1496_v52  ;;  %1318 = vmatpush3.bf16.msra.mxu0 %v1497_v53 }
  0xce   : > { %1370 = vmatprep.subr.bf16.mxu1 %v1714_v0  ;;  %1319 = vmatprep.subr.bf16.mxu0 %v1498_v54 }
  0xd1   : > { %1371 = vmatpush3.bf16.msra.mxu1 %v1499_v55  ;;  %1320 = vmatpush3.bf16.msra.mxu0 %v1500_v56 }
  0xd2   : > { %1372 = vmatprep.subr.bf16.mxu1 %v1714_v0  ;;  %1321 = vmatprep.subr.bf16.mxu0 %v1501_v57 }
  0xd5   : > { %1373 = vmatpush3.bf16.msra.mxu1 %v1502_v58  ;;  %1322 = vmatpush3.bf16.msra.mxu0 %v1503_v59 }
  0xd6   : > { %1374 = vmatprep.subr.bf16.mxu1 %v1714_v0  ;;  %1323 = vmatprep.subr.bf16.mxu0 %v1504_v60 }
  0xd9   : > { %1375 = vmatpush3.bf16.msra.mxu1 %v1505_v61  ;;  %1324 = vmatpush3.bf16.msra.mxu0 %v1506_v62 }
  0xda   : > { %1376 = vmatprep.subr.bf16.mxu1 %v1714_v0  ;;  %1325 = vmatprep.subr.bf16.mxu0 %v1507_v63 }
  0xdd   : > { %1377 = vmatpush3.bf16.msra.mxu1 %v1508_v1  ;;  %1326 = vmatpush3.bf16.msra.mxu0 %v1509_v2 }
 0x193   : > { %v1296_v3 = vpop.f32.mrb[0].mxu0  ;;  %v739_v4 = vpop.f32.mrb[0].mxu1 }
 0x194   : > { %v1297_v5 = vpop.f32.mrb[1].mxu0  ;;  %v1360_v7 = vpop.f32.mrb[1].mxu1 }
 0x195   : > { %v1298_v6 = vadd.f32 %v1297_v5, %v1296_v3  ;;  %v1299_v8 = vpop.f32.mrb[2].mxu0  ;;  %v742_v10 = vpop.f32.mrb[2].mxu1 }
 0x196   : > { %v1300_v11 = vpop.f32.mrb[3].mxu0  ;;  %v1361_v13 = vpop.f32.mrb[3].mxu1 }
 0x197   : > { %v740_v0 = vadd.f32 %v1298_v6, %v739_v4  ;;  %v1301_v12 = vadd.f32 %v1300_v11, %v1299_v8 }
 0x199   : > { %v748_v16 = vadd.f32 %v746_v9, %v740_v0  ;;  %v743_v17 = vadd.f32 %v1301_v12, %v742_v10 }
 0x19b   : > { %v757_v19 = vmul.f32 %v1245_v14, %v748_v16  ;;  %v749_v20 = vadd.f32 %v747_v15, %v743_v17 }
 0x19d   : > { %v766_v21 = vadd.f32 %v1246_v18, %v757_v19  ;;  %v758_v22 = vmul.f32 %v1245_v14, %v749_v20 }
 0x19f   : > { %v768_v23 = vmax.f32 %v766_v21, 0.0  ;;  %v767_v24 = vadd.f32 %v1246_v18, %v758_v22 }
 0x1a1   : > { %770 = vst [vmem:[#allocation3 + $0x1] sm:$0xff] %v768_v23  ;;  %v769_v25 = vmax.f32 %v767_v24, 0.0 }
 0x1a3   : > { %771 = vst [vmem:[#allocation3 + $0x9] sm:$0xff] %v769_v25  ;;  %v779_v26 = vpack.c.bf16 %v769_v25, %v768_v23 }
 0x1a5   : > { %1012 = vmatprep.mubr.bf16.mxu0 %v779_v26 }
 0x1a8   : > { %v772_v27 = vld [vmem:[#allocation3] sm:$0xff] }
 0x1aa   : > { %v776_v28 = vld [vmem:[#allocation3 + $0x2] sm:$0xff]  ;;  %v777_v29 = vld [vmem:[#allocation3 + $0xa] sm:$0xff] }
 0x1ab   : > { %v773_v30 = vld [vmem:[#allocation3 + $0x8] sm:$0xff]  ;;  %v780_v31 = vpack.c.bf16 %v777_v29, %v776_v28 }
 0x1ac   : > { %v778_v32 = vpack.c.bf16 %v773_v30, %v772_v27 }
 0x1ad   : > { %1379 = vmatmul.mubr.bf16.vlgmr.msra.gmra.mrb[4].mxu1 %v780_v31 }
 0x1ae   : > { %1013 = vmatmul.mubr.bf16.vlgmr.msra.gmra.mrb[4].mxu0 %v778_v32 }
 0x280   : > { %v1055_v33 = vpop.f32.mrb[4].mxu1 }
 0x281   : > { %v1327_v34 = vpop.f32.mrb[4].mxu0  ;;  %v1380_v35 = vpop.f32.mrb[5].mxu1 }
 0x282   : > { %v1328_v37 = vpop.f32.mrb[5].mxu0  ;;  %v1058_v39 = vpop.f32.mrb[6].mxu1 }
 0x283   : > { %v1329_v38 = vadd.f32 %v1328_v37, %v1327_v34  ;;  %v1330_v40 = vpop.f32.mrb[6].mxu0  ;;  %v1381_v41 = vpop.f32.mrb[7].mxu1 }
 0x284   : > { %v1331_v42 = vpop.f32.mrb[7].mxu0 }
 0x285   : > { %v1015_v43 = vadd.f32 %v1329_v38, %v1247_v36  ;;  %v1332_v44 = vadd.f32 %v1331_v42, %v1330_v40 }
 0x287   : > { %v1056_v45 = vadd.f32 %v1055_v33, %v1015_v43  ;;  %v1018_v46 = vadd.f32 %v1332_v44, %v1247_v36 }
 0x289   : > { %1062 = vst [vmem:[%s430_s16] sm:$0xff] %v1056_v45  ;;  %v1059_v47 = vadd.f32 %v1058_v39, %v1018_v46 }
 0x28b   : > { %1063 = vst [vmem:[%s430_s16 + $0x8] sm:$0xff] %v1059_v47 }
 0x28c   : > { %1639 = shalt.err (!%p1636_p9)
}
 0x28d   : > { %s1640_s19 = scalar_lea.hbm %s2070_s22, 256  ;;  %s1644_s29 = scalar_lea.hbm %s2123_s9, 512 }
 0x28e   : > { %p1641_p0 = scmp.ne.s32.totalorder %s2070_s22, %s1640_s19  ;;  %p1645_p1 = scmp.lt.u32.totalorder %s2070_s22, %s2123_s9 }
 0x28f   : > { %p1646_p12 = scmp.lt.u32.totalorder %s1644_s29, %s1640_s19  ;;  %p1648_p13 = scmp.lt.u32.totalorder %s1640_s19, %s2070_s22 }
 0x290   : > { %p1642_p8 = pnand %p1641_p0, %p2152_p6 }
 0x291   : > { %p1647_p2 = por %p1646_p12, %p1645_p1 }
 0x292   : > { %p1643_p11 = pneg %p1642_p8 }
 0x293   : > { %p1649_p10 = por %p1648_p13, %p1647_p2 }
 0x295   : > { %p1650_p4 = pnand %p1649_p10, %p1643_p11 }
 0x297   : > { %1653 = shalt.err (!%p1650_p4)
}
 0x298   : > { %s1717_s23 = smov 128   ;;  %s1718_s16 = smov 8  }
 0x299   : > { %1394 = dma.vmem_to_hbm [thread:$0]  (%p2152_p6), %s2065_s0, 256, %s2070_s22, %s1065_s14, %s1717_s23, %s1717_s23, %s1718_s16  }
 0x29a PF: > { %s2153_s17 = sld [smem:[#allocation19_spill]]  ;;  %s1093_s27 = sand.u32 1, %s1692_s30  }
 0x29b   : > { %p2155_p3 = scmp.ge.s32.totalorder %s1704_s12, 2  ;;  %s1094_s15 = scalar_lea.sflag [#allocation6], %s1093_s27 }
 0x2a0   : > { %p2154_p5 = scmp.ne.s32.totalorder %s2153_s17, 0 }
 0x2a2   : > { %p1411_p7 = pnand %p2155_p3, %p2154_p5 }
 0x2a4   : > { %1687 = dma.done.wait (!%p1411_p7), %s1094_s15, 256  }
 0x2a5   : > { %1689 = vsyncadd (!%p1411_p7), %s1094_s15, 4294967040  ;;  %s2156_s25 = sld [smem:[#allocation18_spill]]  ;;  %s2157_s11 = sld [smem:[#allocation20_spill]] }
 0x2a6   : > { %p26_p9 = scmp.ge.s32.totalorder %s1879_s24, 4   ;;  %s2158_s30 = smov %s1696_s10 }
 0x2a7   : > { %s2160_s12 = smov %s1879_s24 }
 0x2a8   :  { %28 = sbr.rel (!%p26_p9) target bundleno = 12 (0xc), region = 125 }
 0x2ab   : > { %s2159_s10 = smov %s2156_s25 }
 0x2af   :  { %1099 = vsyncpa [#allocation5], 1 }
 0x2b0   :  { %1101 = vsyncpa [#allocation5 + $0x1], 1 }
 0x2b1   :  { %1102 = vsyncpa [#allocation8], 1 }
 0x2b2   :  { %1104 = vsyncpa [#allocation8 + $0x1], 1 }
 0x2b3   :  { %1105 = vsyncpa [#allocation11], 1 }
 0x2b4   :  { %1106 = vsyncpa [#allocation6], 1 }
 0x2b5   :  { %1108 = vsyncpa [#allocation6 + $0x1], 1 }

</bundles_post_ra>
